<compile_context>
chip_gen: v7x
topology: tpu7x:2x2x1
jax: 0.10.0
libtpu: 0.0.40
codegen_flags: <defaults>
</compile_context>

<pallas_src>
import functools

import jax
import jax.numpy as jnp
from jax.experimental import pallas as pl
from jax.experimental.pallas import tpu as pltpu


def _round_up(x, m):
    return ((x + m - 1) // m) * m


def _grouped_ffn_kernel(tile_expert_ref,   # SMEM (num_tiles,) int32 (prefetched)
                        x_ref,             # (tm, Dp)  bf16   sorted token rows
                        w1_ref,            # (Dp, th)  bf16   this expert's w1 chunk
                        b1_ref,            # (1, th)   f32
                        w2_ref,            # (th, Dp)  bf16   this expert's w2 chunk
                        b2_ref,            # (1, Dp)   f32
                        o_ref,             # (tm, Dp)  f32    per-row FFN output
                        acc_ref):          # (tm, Dp)  f32    VMEM accumulator
    h_idx = pl.program_id(1)

    @pl.when(h_idx == 0)
    def _():
        acc_ref[...] = jnp.zeros_like(acc_ref)

    x = x_ref[...]                                                    # (tm, Dp) bf16
    h = jnp.dot(x, w1_ref[...], preferred_element_type=jnp.float32)   # (tm, th) f32
    h = h + b1_ref[...]
    h = h * jax.nn.sigmoid(h)                                         # SiLU (f32)
    acc_ref[...] += jnp.dot(h.astype(jnp.bfloat16), w2_ref[...],
                            preferred_element_type=jnp.float32)       # (tm, Dp) f32

    @pl.when(h_idx == pl.num_programs(1) - 1)
    def _():
        o_ref[...] = (acc_ref[...] + b2_ref[...]).astype(o_ref.dtype)


def deepseek_moe_forward(x, params, top_k, *, tm=128, th=512):
    """x: (B, S, D) float32 -> (B, S, D) float32."""
    B, S, D = x.shape
    E, _, H = params["w1"].shape
    T = B * S
    K = top_k

    Dp = _round_up(D, 128)
    Hp = _round_up(H, 128)
    tm = max(8, tm)
    if th > Hp or Hp % th != 0:
        th = 128                                   # 128 always divides Hp

    x_flat = x.reshape(T, D).astype(jnp.float32)

    # ---- gating (plain-JAX glue, matches PyTorch module semantics) ----
    scores = x_flat @ params["Wg"].T + params["bg"] + params["bias"]   # (T, E)
    top_scores, top_idx = jax.lax.top_k(scores, K)                     # (T, K)
    gates = jax.nn.softmax(top_scores, axis=-1)                        # (T, K)

    # ---- group (token, k) pairs by expert; pad each group to tm rows ----
    flat_expert = top_idx.reshape(-1).astype(jnp.int32)                # (T*K,)
    flat_token = jnp.repeat(jnp.arange(T, dtype=jnp.int32), K)         # (T*K,)
    flat_gate = gates.reshape(-1)                                      # (T*K,)

    order = jnp.argsort(flat_expert)
    sort_expert = flat_expert[order]
    sort_token = flat_token[order]
    sort_gate = flat_gate[order]

    counts = jnp.sum(
        flat_expert[:, None] == jnp.arange(E, dtype=jnp.int32)[None, :], axis=0)
    group_pad = ((counts + tm - 1) // tm) * tm
    padded_starts = jnp.concatenate(
        [jnp.zeros((1,), counts.dtype), jnp.cumsum(group_pad)])[:E]
    unpadded_starts = jnp.concatenate(
        [jnp.zeros((1,), counts.dtype), jnp.cumsum(counts)])[:E]
    rank = jnp.arange(T * K, dtype=counts.dtype) - unpadded_starts[sort_expert]
    dest = (padded_starts[sort_expert] + rank).astype(jnp.int32)       # (T*K,)

    R = (pl.cdiv(T * K, tm) + E) * tm      # static upper bound on padded rows
    num_tiles = R // tm

    tile_expert = jnp.searchsorted(
        padded_starts, jnp.arange(num_tiles, dtype=jnp.int32) * tm,
        side="right") - 1
    tile_expert = jnp.clip(tile_expert, 0, E - 1).astype(jnp.int32)

    # ---- pad / pack operands: bf16 matmul inputs, f32 biases ----
    x_pad = jnp.pad(x_flat, ((0, 0), (0, Dp - D))).astype(jnp.bfloat16)
    x_sorted = jnp.zeros((R, Dp), jnp.bfloat16).at[dest].set(x_pad[sort_token])
    gate_rows = jnp.zeros((R,), jnp.float32).at[dest].set(sort_gate)
    token_rows = jnp.zeros((R,), jnp.int32).at[dest].set(sort_token)

    w1 = jnp.pad(params["w1"], ((0, 0), (0, Dp - D), (0, Hp - H))).astype(jnp.bfloat16)
    b1 = jnp.pad(params["b1"], ((0, 0), (0, Hp - H))).astype(jnp.float32).reshape(E, 1, Hp)
    w2 = jnp.pad(params["w2"], ((0, 0), (0, Hp - H), (0, Dp - D))).astype(jnp.bfloat16)
    b2 = jnp.pad(params["b2"], ((0, 0), (0, Dp - D))).astype(jnp.float32).reshape(E, 1, Dp)

    # ---- grouped expert FFN (Pallas hot path) ----
    y_sorted = pl.pallas_call(
        _grouped_ffn_kernel,
        out_shape=jax.ShapeDtypeStruct((R, Dp), jnp.float32),
        grid_spec=pltpu.PrefetchScalarGridSpec(
            num_scalar_prefetch=1,
            grid=(num_tiles, Hp // th),
            in_specs=[
                pl.BlockSpec((tm, Dp), lambda i, h, te: (i, 0)),           # x rows
                pl.BlockSpec((None, Dp, th), lambda i, h, te: (te[i], 0, h)),  # w1
                pl.BlockSpec((None, 1, th), lambda i, h, te: (te[i], 0, h)),   # b1
                pl.BlockSpec((None, th, Dp), lambda i, h, te: (te[i], h, 0)),  # w2
                pl.BlockSpec((None, 1, Dp), lambda i, h, te: (te[i], 0, 0)),   # b2
            ],
            out_specs=pl.BlockSpec((tm, Dp), lambda i, h, te: (i, 0)),
            scratch_shapes=[pltpu.VMEM((tm, Dp), jnp.float32)],
        ),
        compiler_params=pltpu.CompilerParams(
            dimension_semantics=("parallel", "arbitrary")),
    )(tile_expert, x_sorted, w1, b1, w2, b2)

    # ---- combine: gate-weight the rows and scatter-add back to token order ----
    contrib = gate_rows[:, None] * y_sorted                            # (R, Dp) f32
    out = jnp.zeros((T, Dp), jnp.float32).at[token_rows].add(contrib)  # f32 accum
    return out[:, :D].reshape(B, S, D).astype(x.dtype)


def moe_reference(x, params, top_k):
    """Pure-JAX f32 reference matching the PyTorch forward semantics."""
    B, S, D = x.shape
    E = params["w1"].shape[0]
    x_flat = x.reshape(B * S, D).astype(jnp.float32)
    scores = x_flat @ params["Wg"].T + params["bg"] + params["bias"]
    top_scores, top_idx = jax.lax.top_k(scores, top_k)
    gates = jax.nn.softmax(top_scores, axis=-1)
    out = jnp.zeros_like(x_flat)
    for e in range(E):
        h = x_flat @ params["w1"][e] + params["b1"][e]
        y = (h * jax.nn.sigmoid(h)) @ params["w2"][e] + params["b2"][e]
        w_e = jnp.sum(gates * (top_idx == e), axis=-1, keepdims=True)
        out = out + w_e * y
    return out.reshape(B, S, D)


def init_params(key, num_experts, dim, hidden_dim):
    """Deterministic synthetic init (same shapes as the nn.Module params)."""
    ks = jax.random.split(key, 7)
    u = lambda k, shape, fan_in: jax.random.uniform(
        k, shape, jnp.float32, -1.0 / jnp.sqrt(fan_in), 1.0 / jnp.sqrt(fan_in)
    )
    return {
        # experts[e].w1: Linear(dim, hidden)  -> stored transposed as (D, H)
        "w1": u(ks[0], (num_experts, dim, hidden_dim), dim),
        "b1": u(ks[1], (num_experts, hidden_dim), dim),
        # experts[e].w2: Linear(hidden, dim)  -> stored transposed as (H, D)
        "w2": u(ks[2], (num_experts, hidden_dim, dim), hidden_dim),
        "b2": u(ks[3], (num_experts, dim), hidden_dim),
        # gate: Linear(dim, num_experts) (torch layout: (E, D))
        "Wg": u(ks[4], (num_experts, dim), dim),
        "bg": u(ks[5], (num_experts,), dim),
        # auxiliary-free load-balance bias, initialized to zeros
        "bias": jnp.zeros((num_experts,), jnp.float32),
    }


if __name__ == "__main__":
    # Small but hardware-aligned demo shapes (D, H multiples of 128).
    B, S, D, H, E, TOP_K = 2, 16, 128, 256, 8, 2

    key = jax.random.PRNGKey(0)
    k_params, k_x = jax.random.split(key)
    params = init_params(k_params, E, D, H)
    x = jax.random.normal(k_x, (B, S, D), jnp.float32)

    fwd = jax.jit(functools.partial(deepseek_moe_forward, top_k=TOP_K, tm=16, th=128))
    out = jax.block_until_ready(fwd(x, params))

    ref = jax.block_until_ready(moe_reference(x, params, TOP_K))
    assert out.shape == (B, S, D)
    max_err = float(jnp.max(jnp.abs(out - ref)))
    # bf16 matmul inputs with f32 accumulation -> tolerance at bf16 precision.
    assert jnp.allclose(out, ref, rtol=3e-2, atol=3e-2), (
        f"mismatch vs reference (max abs err {max_err})")

    print("KERNEL_OK")
</pallas_src>

<mosaic_0001>
module attributes {stable_mosaic.version = 11 : i64} {
  func.func @_grouped_ffn_kernel(%arg0: i32, %arg1: i32, %arg2: memref<12xi32, #tpu.memory_space<smem>>, %arg3: memref<16x128xbf16, #tpu.memory_space<vmem>>, %arg4: memref<1x128x128xbf16, #tpu.memory_space<vmem>>, %arg5: memref<1x1x128xf32, #tpu.memory_space<vmem>>, %arg6: memref<1x128x128xbf16, #tpu.memory_space<vmem>>, %arg7: memref<1x1x128xf32, #tpu.memory_space<vmem>>, %arg8: memref<16x128xf32, #tpu.memory_space<vmem>>, %arg9: memref<16x128xf32, #tpu.memory_space<vmem>>) attributes {dimension_semantics = [#tpu.dimension_semantics<parallel>, #tpu.dimension_semantics<arbitrary>], iteration_bounds = array<i64: 12, 2>, scalar_prefetch = 1 : i64, scratch_operands = 1 : i64, tpu.core_type = #tpu.core_type<tc>, window_params = [{transform_indices = @transform_0, window_bounds = array<i64: 16, 128>}, {transform_indices = @transform_1, window_bounds = array<i64: 1, 128, 128>}, {transform_indices = @transform_2, window_bounds = array<i64: 1, 1, 128>}, {transform_indices = @transform_3, window_bounds = array<i64: 1, 128, 128>}, {transform_indices = @transform_4, window_bounds = array<i64: 1, 1, 128>}, {transform_indices = @transform_5, window_bounds = array<i64: 16, 128>}]} {
    %c0_i32 = arith.constant 0 : i32
    %0 = arith.cmpi eq, %arg1, %c0_i32 : i32
    %1 = arith.extui %0 : i1 to i32
    %c0_i32_0 = arith.constant 0 : i32
    %2 = arith.cmpi ne, %1, %c0_i32_0 : i32
    scf.if %2 {
      %cst_18 = arith.constant 0.000000e+00 : f32
      %27 = vector.broadcast %cst_18 : f32 to vector<16x128xf32>
      %c0_19 = arith.constant 0 : index
      %c0_20 = arith.constant 0 : index
      %28 = vector.load %arg9[%c0_19, %c0_20] : memref<16x128xf32, #tpu.memory_space<vmem>>, vector<16x128xf32>
      tpu.vector_store %arg9[%c0_19, %c0_20], %27 {strides = array<i32>} : memref<16x128xf32, #tpu.memory_space<vmem>>, vector<16x128xf32>,
    } else {
    }
    %c0 = arith.constant 0 : index
    %c0_1 = arith.constant 0 : index
    %3 = vector.load %arg3[%c0, %c0_1] : memref<16x128xbf16, #tpu.memory_space<vmem>>, vector<16x128xbf16>
    %c0_2 = arith.constant 0 : index
    %c0_3 = arith.constant 0 : index
    %c0_4 = arith.constant 0 : index
    %4 = vector.load %arg4[%c0_2, %c0_3, %c0_4] : memref<1x128x128xbf16, #tpu.memory_space<vmem>>, vector<1x128x128xbf16>
    %5 = vector.shape_cast %4 : vector<1x128x128xbf16> to vector<128x128xbf16>
    %cst = arith.constant dense<0.000000e+00> : vector<16x128xf32>
    %6 = tpu.matmul %3, %5, %cst {dimension_numbers = #tpu.dot_dimension_numbers<[1], [0], [0], [1], [0, 0, 1, 1], [], []>} : vector<16x128xbf16>, vector<128x128xbf16>, vector<16x128xf32> -> vector<16x128xf32>
    %c0_5 = arith.constant 0 : index
    %c0_6 = arith.constant 0 : index
    %c0_7 = arith.constant 0 : index
    %7 = vector.load %arg5[%c0_5, %c0_6, %c0_7] : memref<1x1x128xf32, #tpu.memory_space<vmem>>, vector<1x1x128xf32>
    %8 = vector.shape_cast %7 : vector<1x1x128xf32> to vector<1x128xf32>
    %9 = vector.broadcast %8 : vector<1x128xf32> to vector<16x128xf32>
    %10 = arith.addf %6, %9 : vector<16x128xf32>
    %11 = arith.negf %10 : vector<16x128xf32>
    %12 = math.exp %11 : vector<16x128xf32>
    %cst_8 = arith.constant 1.000000e+00 : f32
    %13 = vector.broadcast %cst_8 : f32 to vector<16x128xf32>
    %14 = arith.addf %13, %12 : vector<16x128xf32>
    %15 = arith.divf %13, %14 : vector<16x128xf32>
    %16 = arith.mulf %10, %15 : vector<16x128xf32>
    %c0_9 = arith.constant 0 : index
    %c0_10 = arith.constant 0 : index
    %17 = vector.load %arg9[%c0_9, %c0_10] : memref<16x128xf32, #tpu.memory_space<vmem>>, vector<16x128xf32>
    %18 = arith.truncf %16 : vector<16x128xf32> to vector<16x128xbf16>
    %c0_11 = arith.constant 0 : index
    %c0_12 = arith.constant 0 : index
    %c0_13 = arith.constant 0 : index
    %19 = vector.load %arg6[%c0_11, %c0_12, %c0_13] : memref<1x128x128xbf16, #tpu.memory_space<vmem>>, vector<1x128x128xbf16>
    %20 = vector.shape_cast %19 : vector<1x128x128xbf16> to vector<128x128xbf16>
    %cst_14 = arith.constant dense<0.000000e+00> : vector<16x128xf32>
    %21 = tpu.matmul %18, %20, %cst_14 {dimension_numbers = #tpu.dot_dimension_numbers<[1], [0], [0], [1], [0, 0, 1, 1], [], []>} : vector<16x128xbf16>, vector<128x128xbf16>, vector<16x128xf32> -> vector<16x128xf32>
    %22 = arith.addf %17, %21 : vector<16x128xf32>
    %c0_15 = arith.constant 0 : index
    %c0_16 = arith.constant 0 : index
    %23 = vector.load %arg9[%c0_15, %c0_16] : memref<16x128xf32, #tpu.memory_space<vmem>>, vector<16x128xf32>
    tpu.vector_store %arg9[%c0_15, %c0_16], %22 {strides = array<i32>} : memref<16x128xf32, #tpu.memory_space<vmem>>, vector<16x128xf32>,
    %c1_i32 = arith.constant 1 : i32
    %24 = arith.cmpi eq, %arg1, %c1_i32 : i32
    %25 = arith.extui %24 : i1 to i32
    %c0_i32_17 = arith.constant 0 : i32
    %26 = arith.cmpi ne, %25, %c0_i32_17 : i32
    scf.if %26 {
      %c0_18 = arith.constant 0 : index
      %c0_19 = arith.constant 0 : index
      %27 = vector.load %arg9[%c0_18, %c0_19] : memref<16x128xf32, #tpu.memory_space<vmem>>, vector<16x128xf32>
      %c0_20 = arith.constant 0 : index
      %c0_21 = arith.constant 0 : index
      %c0_22 = arith.constant 0 : index
      %28 = vector.load %arg7[%c0_20, %c0_21, %c0_22] : memref<1x1x128xf32, #tpu.memory_space<vmem>>, vector<1x1x128xf32>
      %29 = vector.shape_cast %28 : vector<1x1x128xf32> to vector<1x128xf32>
      %30 = vector.broadcast %29 : vector<1x128xf32> to vector<16x128xf32>
      %31 = arith.addf %27, %30 : vector<16x128xf32>
      %c0_23 = arith.constant 0 : index
      %c0_24 = arith.constant 0 : index
      %32 = vector.load %arg8[%c0_23, %c0_24] : memref<16x128xf32, #tpu.memory_space<vmem>>, vector<16x128xf32>
      tpu.vector_store %arg8[%c0_23, %c0_24], %31 {strides = array<i32>} : memref<16x128xf32, #tpu.memory_space<vmem>>, vector<16x128xf32>,
    } else {
    }
    return
  }
  func.func @transform_0(%arg0: i32, %arg1: i32, %arg2: memref<12xi32, #tpu.memory_space<smem>>) -> (i32, i32) {
    %c0_i32 = arith.constant 0 : i32
    %c0_i32_0 = arith.constant 0 : i32
    return %arg0, %c0_i32 : i32, i32
  }
  func.func @transform_1(%arg0: i32, %arg1: i32, %arg2: memref<12xi32, #tpu.memory_space<smem>>) -> (i32, i32, i32) {
    %0 = arith.index_cast %arg0 : i32 to index
    %1 = memref.load %arg2[%0] : memref<12xi32, #tpu.memory_space<smem>>
    %c0_i32 = arith.constant 0 : i32
    %c0_i32_0 = arith.constant 0 : i32
    return %1, %c0_i32, %arg1 : i32, i32, i32
  }
  func.func @transform_2(%arg0: i32, %arg1: i32, %arg2: memref<12xi32, #tpu.memory_space<smem>>) -> (i32, i32, i32) {
    %0 = arith.index_cast %arg0 : i32 to index
    %1 = memref.load %arg2[%0] : memref<12xi32, #tpu.memory_space<smem>>
    %c0_i32 = arith.constant 0 : i32
    %c0_i32_0 = arith.constant 0 : i32
    return %1, %c0_i32, %arg1 : i32, i32, i32
  }
  func.func @transform_3(%arg0: i32, %arg1: i32, %arg2: memref<12xi32, #tpu.memory_space<smem>>) -> (i32, i32, i32) {
    %0 = arith.index_cast %arg0 : i32 to index
    %1 = memref.load %arg2[%0] : memref<12xi32, #tpu.memory_space<smem>>
    %c0_i32 = arith.constant 0 : i32
    %c0_i32_0 = arith.constant 0 : i32
    return %1, %arg1, %c0_i32 : i32, i32, i32
  }
  func.func @transform_4(%arg0: i32, %arg1: i32, %arg2: memref<12xi32, #tpu.memory_space<smem>>) -> (i32, i32, i32) {
    %0 = arith.index_cast %arg0 : i32 to index
    %1 = memref.load %arg2[%0] : memref<12xi32, #tpu.memory_space<smem>>
    %c0_i32 = arith.constant 0 : i32
    %c0_i32_0 = arith.constant 0 : i32
    %c0_i32_1 = arith.constant 0 : i32
    return %1, %c0_i32, %c0_i32_0 : i32, i32, i32
  }
  func.func @transform_5(%arg0: i32, %arg1: i32, %arg2: memref<12xi32, #tpu.memory_space<smem>>) -> (i32, i32) {
    %c0_i32 = arith.constant 0 : i32
    %c0_i32_0 = arith.constant 0 : i32
    return %arg0, %c0_i32 : i32, i32
  }
}

</mosaic_0001>

<bundles_post_ra>
// kernel: custom-call.1
= control target key start
LH: loop header
LB: loop body
LE: loop exit
PB: predicated region body
PF: predicated region fallthrough
CT: control target
= control target key end

     0   :  { %s6_s0 = inlined_call_operand.vmem [shape: u32[12], index: 0, kind: output, shape index: {}]  }

// kernel: eq.8
= control target key start
LH: loop header
LB: loop body
LE: loop exit
PB: predicated region body
PF: predicated region fallthrough
CT: control target
= control target key end

     0   :  { %s259_s10 = smov 62   ;;  %s260_s11 = smov 58   ;;  %vm3_vm0 = vcmask 15360   ;;  %vm9_vm1 = vcmask 523760   ;;  %vm15_vm2 = vcmask 507360   ;;  %vm21_vm3 = vcmask 490960   ;;  %s399_s0 = inlined_call_operand.vmem [shape: s32[32,2], index: 0, kind: input, shape index: {}]   ;;  %s400_s1 = inlined_call_operand.vmem [shape: s32[64], index: 1, kind: output, shape index: {}]  }
   0x1   :  { %v197_v0 = vld [vmem:[%s399_s0 + $0x1f] sm:$0x1]   ;;  %v199_v1 = vld [vmem:[%s399_s0 + $0x1d] sm:$0x1]   ;;  %v198_v2 = vld [vmem:[%s399_s0 + $0x1e] sm:$0x1]  }
   0x2   :  { %7 = vrot.lane.b32.xlu0 %v197_v0, %s259_s10  ;;  %19 = vrot.lane.b32.xlu1 %v199_v1, %s260_s11  ;;  %v200_v3 = vld [vmem:[%s399_s0 + $0x1c] sm:$0x1]   ;;  %s261_s16 = smov 60   ;;  %s262_s17 = smov 56   ;;  %v201_v4 = vld [vmem:[%s399_s0 + $0x1b] sm:$0x1]  }
   0x3   :  { %v202_v5 = vld [vmem:[%s399_s0 + $0x1a] sm:$0x1]   ;;  %s263_s22 = smov 54   ;;  %s264_s23 = smov 52   ;;  %v203_v6 = vld [vmem:[%s399_s0 + $0x19] sm:$0x1]  }
   0x4   :  { %v204_v7 = vld [vmem:[%s399_s0 + $0x18] sm:$0x1]   ;;  %s265_s28 = smov 50   ;;  %s266_s29 = smov 48   ;;  %v205_v8 = vld [vmem:[%s399_s0 + $0x17] sm:$0x1]  }
   0x5   :  { %v206_v9 = vld [vmem:[%s399_s0 + $0x16] sm:$0x1]   ;;  %v2_v10 = vld [vmem:[%s399_s0] sm:$0x1]   ;;  %s267_s7 = smov 46   ;;  %s268_s8 = smov 44  }
   0x6   :  { %13 = vrot.lane.b32.xlu0 %v198_v2, %s261_s16  ;;  %25 = vrot.lane.b32.xlu1 %v200_v3, %s262_s17  ;;  %4 = vst.msk [vmem:[#allocation0] sm:$0x1] %vm3_vm0, %v2_v10   ;;  %v207_v11 = vld [vmem:[%s399_s0 + $0x15] sm:$0x1]   ;;  %v208_v12 = vld [vmem:[%s399_s0 + $0x14] sm:$0x1]  }
   0x7   :  { %s269_s13 = smov 42   ;;  %s270_s14 = smov 40   ;;  %v209_v13 = vld [vmem:[%s399_s0 + $0x13] sm:$0x1]   ;;  %v210_v14 = vld [vmem:[%s399_s0 + $0x12] sm:$0x1]  }
   0x8   :  { %s271_s19 = smov 38   ;;  %s272_s20 = smov 36   ;;  %v211_v15 = vld [vmem:[%s399_s0 + $0x11] sm:$0x1]   ;;  %v212_v16 = vld [vmem:[%s399_s0 + $0x10] sm:$0x1]  }
   0x9   :  { %s273_s25 = smov 34   ;;  %s274_s26 = smov 32   ;;  %v213_v17 = vld [vmem:[%s399_s0 + $0xf] sm:$0x1]   ;;  %v214_v18 = vld [vmem:[%s399_s0 + $0xe] sm:$0x1]  }
   0xa   :  { %31 = vrot.lane.b32.xlu0 %v201_v4, %s263_s22  ;;  %37 = vrot.lane.b32.xlu1 %v202_v5, %s264_s23  ;;  %s275_s2 = smov 30   ;;  %s276_s3 = smov 28   ;;  %v215_v19 = vld [vmem:[%s399_s0 + $0xd] sm:$0x1]   ;;  %v216_v20 = vld [vmem:[%s399_s0 + $0xc] sm:$0x1]  }
   0xb   :  { %s278_s9 = smov 24   ;;  %v217_v21 = vld [vmem:[%s399_s0 + $0xb] sm:$0x1]   ;;  %v218_v22 = vld [vmem:[%s399_s0 + $0xa] sm:$0x1]   ;;  %s280_s15 = smov 20  }
   0xc   :  { %v219_v23 = vld [vmem:[%s399_s0 + $0x9] sm:$0x1]   ;;  %v220_v24 = vld [vmem:[%s399_s0 + $0x8] sm:$0x1]   ;;  %s282_s21 = smov 16   ;;  %s284_s27 = smov 12  }
   0xd   :  { %v221_v25 = vld [vmem:[%s399_s0 + $0x7] sm:$0x1]   ;;  %v222_v26 = vld [vmem:[%s399_s0 + $0x6] sm:$0x1]   ;;  %v223_v27 = vld [vmem:[%s399_s0 + $0x5] sm:$0x1]  }
   0xe   :  { %43 = vrot.lane.b32.xlu0 %v203_v6, %s265_s28  ;;  %49 = vrot.lane.b32.xlu1 %v204_v7, %s266_s29  ;;  %v224_v28 = vld [vmem:[%s399_s0 + $0x4] sm:$0x1]   ;;  %s286_s4 = smov 8   ;;  %v225_v29 = vld [vmem:[%s399_s0 + $0x3] sm:$0x1]   ;;  %s288_s10 = smov 4  }
   0xf   :  { %v226_v30 = vld [vmem:[%s399_s0 + $0x2] sm:$0x1]   ;;  %v227_v31 = vld [vmem:[%s399_s0 + $0x1] sm:$0x1]   ;;  %s289_s0 = smov 2   ;;  %vm27_vm4 = vcmask 474560  }
  0x10   :  { %vm33_vm5 = vcmask 458160   ;;  %vm39_vm6 = vcmask 441760   ;;  %vm45_vm7 = vcmask 425360   ;;  %vm51_vm8 = vcmask 408960  }
  0x11   :  { %vm57_vm9 = vcmask 392560   ;;  %vm63_vm10 = vcmask 376160   ;;  %vm69_vm11 = vcmask 359760   ;;  %vm75_vm12 = vcmask 343360  }
  0x12   :  { %55 = vrot.lane.b32.xlu0 %v205_v8, %s267_s7  ;;  %61 = vrot.lane.b32.xlu1 %v206_v9, %s268_s8  ;;  %s277_s8 = smov 26   ;;  %vm81_vm13 = vcmask 326960   ;;  %vm87_vm14 = vcmask 310560   ;;  %vm93_vm15 = vcmask 294160   ;;  %vm99_vm0 = vcmask 277760  }
  0x16   :  { %67 = vrot.lane.b32.xlu0 %v207_v11, %s269_s13  ;;  %73 = vrot.lane.b32.xlu1 %v208_v12, %s270_s14  ;;  %s279_s14 = smov 22  }
  0x1a   :  { %79 = vrot.lane.b32.xlu0 %v209_v13, %s271_s19  ;;  %85 = vrot.lane.b32.xlu1 %v210_v14, %s272_s20  ;;  %s281_s20 = smov 18  }
  0x1e   :  { %91 = vrot.lane.b32.xlu0 %v211_v15, %s273_s25  ;;  %97 = vrot.lane.b32.xlu1 %v212_v16, %s274_s26  ;;  %s283_s26 = smov 14  }
  0x22   :  { %103 = vrot.lane.b32.xlu0 %v213_v17, %s275_s2  ;;  %109 = vrot.lane.b32.xlu1 %v214_v18, %s276_s3  ;;  %s285_s3 = smov 10  }
  0x26   :  { %115 = vrot.lane.b32.xlu0 %v215_v19, %s277_s8  ;;  %121 = vrot.lane.b32.xlu1 %v216_v20, %s278_s9  ;;  %s287_s9 = smov 6  }
  0x2a   :  { %127 = vrot.lane.b32.xlu0 %v217_v21, %s279_s14  ;;  %133 = vrot.lane.b32.xlu1 %v218_v22, %s280_s15 }
  0x2e   :  { %139 = vrot.lane.b32.xlu0 %v219_v23, %s281_s20  ;;  %145 = vrot.lane.b32.xlu1 %v220_v24, %s282_s21 }
  0x32   :  { %151 = vrot.lane.b32.xlu0 %v221_v25, %s283_s26  ;;  %157 = vrot.lane.b32.xlu1 %v222_v26, %s284_s27 }
  0x36   :  { %163 = vrot.lane.b32.xlu0 %v223_v27, %s285_s3  ;;  %169 = vrot.lane.b32.xlu1 %v224_v28, %s286_s4 }
  0x3a   :  { %175 = vrot.lane.b32.xlu0 %v225_v29, %s287_s9  ;;  %181 = vrot.lane.b32.xlu1 %v226_v30, %s288_s10 }
  0x3e   :  { %187 = vrot.lane.b32.xlu0 %v227_v31, %s289_s0 }
  0x74   :  { %v8_v32 = vpop.permute.xlu0 %7   ;;  %v20_v33 = vpop.permute.xlu1 %19  }
  0x75   :  { %10 = vst.msk [vmem:[#allocation0] sm:$0x1] %vm9_vm1, %v8_v32   ;;  %vm105_vm1 = vcmask 261360  }
  0x78   :  { %v14_v34 = vpop.permute.xlu0 %13   ;;  %v26_v35 = vpop.permute.xlu1 %25  }
  0x79   :  { %16 = vst.msk [vmem:[#allocation0] sm:$0x1] %vm15_vm2, %v14_v34   ;;  %vm111_vm2 = vcmask 244960  }
  0x7a   :  { %22 = vst.msk [vmem:[#allocation0] sm:$0x1] %vm21_vm3, %v20_v33   ;;  %vm117_vm3 = vcmask 228560  }
  0x7b   :  { %28 = vst.msk [vmem:[#allocation0] sm:$0x1] %vm27_vm4, %v26_v35   ;;  %vm123_vm4 = vcmask 212160  }
  0x7c   :  { %v32_v36 = vpop.permute.xlu0 %31   ;;  %v38_v37 = vpop.permute.xlu1 %37  }
  0x7d   :  { %34 = vst.msk [vmem:[#allocation0] sm:$0x1] %vm33_vm5, %v32_v36   ;;  %vm129_vm5 = vcmask 195760  }
  0x7e   :  { %40 = vst.msk [vmem:[#allocation0] sm:$0x1] %vm39_vm6, %v38_v37   ;;  %vm135_vm6 = vcmask 179360  }
  0x80   :  { %v44_v38 = vpop.permute.xlu0 %43   ;;  %v50_v39 = vpop.permute.xlu1 %49  }
  0x81   :  { %46 = vst.msk [vmem:[#allocation0] sm:$0x1] %vm45_vm7, %v44_v38   ;;  %vm141_vm7 = vcmask 162960  }
  0x82   :  { %52 = vst.msk [vmem:[#allocation0] sm:$0x1] %vm51_vm8, %v50_v39   ;;  %vm147_vm8 = vcmask 146560  }
  0x84   :  { %v56_v40 = vpop.permute.xlu0 %55   ;;  %v62_v41 = vpop.permute.xlu1 %61  }
  0x85   :  { %58 = vst.msk [vmem:[#allocation0] sm:$0x1] %vm57_vm9, %v56_v40   ;;  %vm153_vm9 = vcmask 130160  }
  0x86   :  { %64 = vst.msk [vmem:[#allocation0] sm:$0x1] %vm63_vm10, %v62_v41   ;;  %vm159_vm10 = vcmask 113760  }
  0x88   :  { %v68_v42 = vpop.permute.xlu0 %67   ;;  %v74_v43 = vpop.permute.xlu1 %73  }
  0x89   :  { %70 = vst.msk [vmem:[#allocation0] sm:$0x1] %vm69_vm11, %v68_v42   ;;  %vm165_vm11 = vcmask 97360  }
  0x8a   :  { %76 = vst.msk [vmem:[#allocation0] sm:$0x1] %vm75_vm12, %v74_v43   ;;  %vm171_vm12 = vcmask 80960  }
  0x8c   :  { %v80_v44 = vpop.permute.xlu0 %79   ;;  %v86_v45 = vpop.permute.xlu1 %85  }
  0x8d   :  { %82 = vst.msk [vmem:[#allocation0] sm:$0x1] %vm81_vm13, %v80_v44   ;;  %vm177_vm13 = vcmask 64560  }
  0x8e   :  { %88 = vst.msk [vmem:[#allocation0] sm:$0x1] %vm87_vm14, %v86_v45   ;;  %vm183_vm14 = vcmask 48160  }
  0x90   :  { %v92_v46 = vpop.permute.xlu0 %91   ;;  %v98_v47 = vpop.permute.xlu1 %97  }
  0x91   :  { %94 = vst.msk [vmem:[#allocation0] sm:$0x1] %vm93_vm15, %v92_v46   ;;  %vm189_vm15 = vcmask 31760  }
  0x92   :  { %100 = vst.msk [vmem:[#allocation0] sm:$0x1] %vm99_vm0, %v98_v47  }
  0x94   :  { %v104_v48 = vpop.permute.xlu0 %103   ;;  %v110_v49 = vpop.permute.xlu1 %109  }
  0x95   :  { %106 = vst.msk [vmem:[#allocation0] sm:$0x1] %vm105_vm1, %v104_v48  }
  0x96   :  { %112 = vst.msk [vmem:[#allocation0] sm:$0x1] %vm111_vm2, %v110_v49  }
  0x98   :  { %v116_v50 = vpop.permute.xlu0 %115   ;;  %v122_v51 = vpop.permute.xlu1 %121  }
  0x99   :  { %118 = vst.msk [vmem:[#allocation0] sm:$0x1] %vm117_vm3, %v116_v50  }
  0x9a   :  { %124 = vst.msk [vmem:[#allocation0] sm:$0x1] %vm123_vm4, %v122_v51  }
  0x9c   :  { %v128_v52 = vpop.permute.xlu0 %127   ;;  %v134_v53 = vpop.permute.xlu1 %133  }
  0x9d   :  { %130 = vst.msk [vmem:[#allocation0] sm:$0x1] %vm129_vm5, %v128_v52  }
  0x9e   :  { %136 = vst.msk [vmem:[#allocation0] sm:$0x1] %vm135_vm6, %v134_v53  }
  0xa0   :  { %v140_v54 = vpop.permute.xlu0 %139   ;;  %v146_v55 = vpop.permute.xlu1 %145  }
  0xa1   :  { %142 = vst.msk [vmem:[#allocation0] sm:$0x1] %vm141_vm7, %v140_v54  }
  0xa2   :  { %148 = vst.msk [vmem:[#allocation0] sm:$0x1] %vm147_vm8, %v146_v55  }
  0xa4   :  { %v152_v56 = vpop.permute.xlu0 %151   ;;  %v158_v57 = vpop.permute.xlu1 %157  }
  0xa5   :  { %154 = vst.msk [vmem:[#allocation0] sm:$0x1] %vm153_vm9, %v152_v56  }
  0xa6   :  { %160 = vst.msk [vmem:[#allocation0] sm:$0x1] %vm159_vm10, %v158_v57  }
  0xa8   :  { %v164_v58 = vpop.permute.xlu0 %163   ;;  %v170_v59 = vpop.permute.xlu1 %169  }
  0xa9   :  { %166 = vst.msk [vmem:[#allocation0] sm:$0x1] %vm165_vm11, %v164_v58  }
  0xaa   :  { %172 = vst.msk [vmem:[#allocation0] sm:$0x1] %vm171_vm12, %v170_v59  }
  0xac   :  { %v176_v60 = vpop.permute.xlu0 %175   ;;  %v182_v61 = vpop.permute.xlu1 %181  }
  0xad   :  { %178 = vst.msk [vmem:[#allocation0] sm:$0x1] %vm177_vm13, %v176_v60  }
  0xae   :  { %184 = vst.msk [vmem:[#allocation0] sm:$0x1] %vm183_vm14, %v182_v61  }
  0xb0   :  { %v188_v62 = vpop.permute.xlu0 %187  }
  0xb1   :  { %190 = vst.msk [vmem:[#allocation0] sm:$0x1] %vm189_vm15, %v188_v62  }
  0xb8   :  { %v194_v63 = vld [vmem:[#allocation0] sm:$0x1] }
  0xb9   :  { %196 = vst [vmem:[%s400_s1] sm:$0x1] %v194_v63 }

// kernel: deepseek_moe_forward.1
= control target key start
LH: loop header
LB: loop body
LE: loop exit
PB: predicated region body
PF: predicated region fallthrough
CT: control target
= control target key end

     0   :  { %s1344_s0 = inlined_call_operand.vmem [shape: s32[12], index: 0, kind: input, shape index: {}]   ;;  %s1345_s1 = inlined_call_operand.vmem [shape: bf16[192,128], index: 1, kind: input, shape index: {}]   ;;  %s1346_s2 = inlined_call_operand.vmem [shape: bf16[8,128,256], index: 2, kind: input, shape index: {}]   ;;  %s1347_s3 = inlined_call_operand.vmem [shape: f32[8,1,256], index: 3, kind: input, shape index: {}]   ;;  %s1348_s4 = inlined_call_operand.vmem [shape: bf16[8,256,128], index: 4, kind: input, shape index: {}]   ;;  %s1349_s5 = inlined_call_operand.vmem [shape: f32[8,1,128], index: 5, kind: input, shape index: {}]   ;;  %s1350_s6 = inlined_call_operand.vmem [shape: f32[192,128], index: 6, kind: output, shape index: {}]  }
   0x1   :  { %1351 = sst [smem:[#allocation7_spill]] %s1345_s1  ;;  %s11_s23 = sshll.u32 %s1344_s0, 4  ;;  %s12_s23 = int_to_ptr.vmem [resolvable:$true] %s11_s23 }
   0x2   :  { %1352 = sst [smem:[#allocation8_spill]] %s1346_s2  ;;  %s1060_s24 = scalar_lea.vmem %s12_s23, 16 }
   0x3   :  { %1353 = sst [smem:[#allocation9_spill]] %s1350_s6  ;;  %p1061_p0 = scmp.ne.s32.totalorder %s12_s23, %s1060_s24 }
   0x4   :  { %p1065_p1 = scmp.lt.s32.totalorder %s12_s23, %s12_s23  ;;  %p1066_p2 = scmp.lt.s32.totalorder %s1060_s24, %s1060_s24 }
   0x6   :  { %p1067_p3 = por %p1066_p2, %p1065_p1 }
   0x8   :  { %p1068_p4 = pnand %p1067_p3, %p1061_p0 }
   0xa   :  { %1071 = shalt.err (!%p1068_p4)  }
   0xb   :  { %s1130_s25 = smov [#allocation4]  }
   0xc   :  { %14 = dma.vmem_to_smem %s12_s23, 16, %s1130_s25, [#allocation3] }
   0xd   :  { %1100 = dma.done.wait [#allocation3], 16 }
   0xe   :  { %1101 = vsyncadd [#allocation3], 4294967280 }
   0xf   :  { %16 = sfence }
  0x10   :  { %s1172_s26 = smov 0   ;;  %s1174_s27 = smov 0  }
  0x11   :  { %s1176_s28 = smov 0   ;;  %s1178_s0 = smov 0  }
  0x12   :  { %s1180_s29 = smov 0   ;;  %s1182_s30 = smov 0  }
  0x13   :  { %s1184_s7 = smov 0  }
  0x14 LB: > { %s31_s8 = sadd.s32 1, %s1120_s29  ;;  %s34_s9 = sadd.s32 1, %s1124_s30  ;;  %s1128_s7 = sphi %s1184_s7, %s22_s7   ;;  %s1124_s30 = sphi %s1182_s30, %s1362_s30   ;;  %s1120_s29 = sphi %s1180_s29, %s1361_s29   ;;  %s1116_s0 = sphi %s1178_s0, %s1360_s0   ;;  %s1112_s28 = sphi %s1176_s28, %s1359_s28   ;;  %s1108_s27 = sphi %s1174_s27, %s1358_s27   ;;  %s1104_s26 = sphi %s1172_s26, %s1357_s26  }
  0x15   : > { %p32_p5 = scmp.ge.s32.totalorder %s31_s8, 2  ;;  %p78_p6 = scmp.ne.s32.totalorder %s1108_s27, %s1104_s26 }
  0x16   : > { %p79_p7 = scmp.eq.s32.totalorder %s1128_s7, 0  ;;  %s64_s10 = sld [smem:[#allocation4 + %s1124_s30]] }
  0x17   : > { %s1364_s9 = smov (!%p32_p5, %s34_s9), %s1124_s30  ;;  %s1368_s8 = smov (%p32_p5, %s31_s8), 0 }
  0x18   : > { %p36_p8 = scmp.ge.s32.totalorder %s1364_s9, 12  ;;  %p80_p9 = por %p79_p7, %p78_p6 }
  0x19   : > { %s67_s12 = ssub.s32 %s1120_s29, %s1368_s8  ;;  %s71_s15 = sadd.s32 1, %s1108_s27 }
  0x1a   : > { %s1366_s9 = smov (%p36_p8, %s1364_s9), 0  ;;  %p878_p11 = scmp.ge.s32.totalorder %s1128_s7, 24 }
  0x1b   : > { %s65_s11 = sld [smem:[#allocation4 + %s1366_s9]] }
  0x1f   : > { %218 = sbr.rel (%p878_p11) target bundleno = 59 (0x3b), region = 16 }
  0x21   : > { %s66_s13 = ssub.s32 %s64_s10, %s65_s11 }
  0x22   : > { %s68_s14 = sor.u32 %s67_s12, %s66_s13 }
  0x23   : > { %p69_p10 = scmp.eq.s32.totalorder %s68_s14, 0 }
  0x25   : > { %s1223_s16 = scalar_select %p69_p10, %s1108_s27, %s71_s15  }
  0x26   : > { %230 = sbr.rel (!%p80_p9) target bundleno = 59 (0x3b), region = 24  ;;  %s235_s17 = sld [smem:[#allocation4 + %s1124_s30]] (%p80_p9) }
  0x27   : > { %s232_s18 = sand.u32 (%p80_p9), 1, %s1108_s27   ;;  %s1354_s2 = sld [smem:[#allocation8_spill]] (%p80_p9) }
  0x28   : > { %s879_s19 = sshll.u32 (%p80_p9), %s232_s18, 6 }
  0x29   : > { %s234_s10 = scalar_lea.vmem (%p80_p9), [#allocation5], %s879_s19 }
  0x2c   : > { %s880_s20 = sshll.u32 (%p80_p9), %s235_s17, 5 }
  0x2d   : > { %s237_s21 = sadd.s32 %s1120_s29, %s880_s20 }
  0x2e   : > { %s881_s22 = sshll.u32 %s237_s21, 2 }
  0x2f   : > { %s1232_s25 = scalar_lea.vmem %s1354_s2, %s881_s22 }
  0x30   : > { %v255_v0 = vld [vmem:[%s1232_s25] sm:$0xf]  ;;  %v257_v1 = vld [vmem:[%s1232_s25 + $0x8] sm:$0xf]  ;;  %v259_v2 = vld [vmem:[%s1232_s25 + $0x10] sm:$0xf] }
  0x31   : > { %256 = vst [vmem:[%s234_s10] sm:$0xf] %v255_v0  ;;  %258 = vst [vmem:[%s234_s10 + $0x4] sm:$0xf] %v257_v1  ;;  %v261_v3 = vld [vmem:[%s1232_s25 + $0x18] sm:$0xf] }
  0x32   : > { %260 = vst [vmem:[%s234_s10 + $0x8] sm:$0xf] %v259_v2  ;;  %v263_v4 = vld [vmem:[%s1232_s25 + $0x20] sm:$0xf]  ;;  %v265_v5 = vld [vmem:[%s1232_s25 + $0x28] sm:$0xf] }
  0x33   : > { %262 = vst [vmem:[%s234_s10 + $0xc] sm:$0xf] %v261_v3  ;;  %264 = vst [vmem:[%s234_s10 + $0x10] sm:$0xf] %v263_v4  ;;  %v267_v6 = vld [vmem:[%s1232_s25 + $0x30] sm:$0xf] }
  0x34   : > { %266 = vst [vmem:[%s234_s10 + $0x14] sm:$0xf] %v265_v5  ;;  %v269_v7 = vld [vmem:[%s1232_s25 + $0x38] sm:$0xf]  ;;  %v271_v8 = vld [vmem:[%s1232_s25 + $0x40] sm:$0xf] }
  0x35   : > { %268 = vst [vmem:[%s234_s10 + $0x18] sm:$0xf] %v267_v6  ;;  %270 = vst [vmem:[%s234_s10 + $0x1c] sm:$0xf] %v269_v7  ;;  %v273_v9 = vld [vmem:[%s1232_s25 + $0x48] sm:$0xf] }
  0x36   : > { %272 = vst [vmem:[%s234_s10 + $0x20] sm:$0xf] %v271_v8  ;;  %v275_v10 = vld [vmem:[%s1232_s25 + $0x50] sm:$0xf]  ;;  %v277_v11 = vld [vmem:[%s1232_s25 + $0x58] sm:$0xf] }
  0x37   : > { %274 = vst [vmem:[%s234_s10 + $0x24] sm:$0xf] %v273_v9  ;;  %276 = vst [vmem:[%s234_s10 + $0x28] sm:$0xf] %v275_v10  ;;  %v279_v12 = vld [vmem:[%s1232_s25 + $0x60] sm:$0xf] }
  0x38   : > { %278 = vst [vmem:[%s234_s10 + $0x2c] sm:$0xf] %v277_v11  ;;  %v281_v13 = vld [vmem:[%s1232_s25 + $0x68] sm:$0xf]  ;;  %v283_v14 = vld [vmem:[%s1232_s25 + $0x70] sm:$0xf] }
  0x39   : > { %280 = vst [vmem:[%s234_s10 + $0x30] sm:$0xf] %v279_v12  ;;  %282 = vst [vmem:[%s234_s10 + $0x34] sm:$0xf] %v281_v13  ;;  %v285_v15 = vld [vmem:[%s1232_s25 + $0x78] sm:$0xf] }
  0x3a   : > { %284 = vst [vmem:[%s234_s10 + $0x38] sm:$0xf] %v283_v14  ;;  %286 = vst [vmem:[%s234_s10 + $0x3c] sm:$0xf] %v285_v15 }
  0x3b PF: > { %p882_p12 = scmp.ge.s32.totalorder %s1128_s7, 1  ;;  %p375_p13 = scmp.lt.s32.totalorder %s1128_s7, 25 }
  0x3d   : > { %p376_p0 = pnand %p882_p12, %p375_p13 }
  0x3e   : > { %s382_s11 = sand.u32 (!%p376_p0), 1, %s1104_s26   ;;  %s884_s12 = sshll.u32 (!%p376_p0), %s1116_s0, 1 }
  0x3f   : > { %379 = sbr.rel (%p376_p0) target bundleno = 594 (0x252), region = 77  ;;  %s1254_s13 = sshll.u32 (!%p376_p0), %s382_s11, 6 }
  0x40   : > { %p437_p1 = scmp.lt.s32.totalorder (!%p376_p0), %s884_s12, 23  ;;  %s443_s14 = sld [smem:[#allocation4 + %s1116_s0]] (!%p376_p0) }
  0x41   : > { %p446_p2 = scmp.lt.s32.totalorder (!%p376_p0), %s1112_s28, 1  ;;  %s452_s15 = sld [smem:[#allocation4 + %s1116_s0]] (!%p376_p0) }
  0x42   : > { %s887_s18 = sshll.u32 (!%p376_p0), %s1112_s28, 4  ;;  %s1355_s1 = sld [smem:[#allocation7_spill]] (!%p376_p0) }
  0x43   : > { %p456_p3 = scmp.lt.s32.totalorder (!%p376_p0), %s887_s18, 31  ;;  %s464_s23 = sld [smem:[#allocation4 + %s1116_s0]] (!%p376_p0) }
  0x44   : > { %s1356_s6 = sld [smem:[#allocation9_spill]] (!%p376_p0)  ;;  %p892_p7 = scmp.ne.s32.totalorder (!%p376_p0), %s1112_s28, 0 }
  0x46   : > { %s1370_s12 = smov (!%p437_p1, %s884_s12), 23  ;;  %p444_p4 = scmp.lt.s32.totalorder %s443_s14, 7  ;;  %v1131_v16 = vmov (!%p892_p7), 0.0  }
  0x47   : > { %s885_s17 = sshll.u32 %s1370_s12, 2  ;;  %s1372_s18 = smov (!%p456_p3, %s887_s18), 31  ;;  %480 = vst [vmem:[#allocation2] sm:$0xff] (!%p892_p7), %v1131_v16  ;;  %481 = vst [vmem:[#allocation2 + $0x8] sm:$0xff] (!%p892_p7), %v1131_v16 }
  0x48   : > { %s1263_s21 = scalar_lea.vmem %s1355_s1, %s885_s17  ;;  %s1374_s14 = smov (!%p444_p4, %s443_s14), 7 }
  0x49   : > { %s447_s22 = scalar_select %p446_p2, %s1112_s28, 1 }
  0x4a   : > { %p454_p5 = scmp.lt.s32.totalorder %s452_s15, 7  ;;  %s891_s26 = sshll.u32 %s1370_s12, 3 }
  0x4b   : > { %s886_s24 = sshll.u32 %s1374_s14, 1  ;;  %s1270_s11 = scalar_lea.vmem %s1356_s6, %s891_s26 }
  0x4c   : > { %s1272_s2 = sadd.s32 %s886_s24, %s447_s22  ;;  %p465_p6 = scmp.lt.s32.totalorder %s464_s23, 7 }
  0x4d   : > { %s450_s20 = scalar_lea.vmem %s1347_s3, %s1272_s2  ;;  %s1376_s15 = smov (!%p454_p5, %s452_s15), 7 }
  0x4e   : > { %s1378_s23 = smov (!%p465_p6, %s464_s23), 7  ;;  %s888_s0 = sshll.u32 %s1376_s15, 5 }
  0x4f   : > { %s459_s12 = sadd.s32 %s888_s0, %s1372_s18  ;;  %s467_s25 = scalar_lea.vmem %s1349_s5, %s1378_s23 }
  0x50   : > { %s889_s26 = sshll.u32 %s459_s12, 2  ;;  %s1290_s6 = scalar_lea.vmem [#allocation5], %s1254_s13 }
  0x51   : > { %s1287_s24 = scalar_lea.vmem %s1348_s4, %s889_s26  ;;  %479 = sbr.rel (%p892_p7) target bundleno = 88 (0x58), region = 85 }
  0x58 PF: > { %v1035_v17 = vld [vmem:[%s1290_s6] sm:$0xff]   ;;  %v1132_v18 = vmov 0.0   ;;  %v1036_v19 = vld [vmem:[%s1290_s6 + $0x8] sm:$0xff]   ;;  %vm1133_vm0 = vmmov 0   ;;  %v1037_v20 = vld [vmem:[%s1290_s6 + $0x10] sm:$0xff]   ;;  %p913_p8 = scmp.ne.s32.totalorder %s1112_s28, 1 }
  0x59   : > { %935 = vmatprep.subr.bf16.mxu0 %v1132_v18  ;;  %955 = vmatprep.subr.bf16.mxu1 %v1132_v18  ;;  %v1038_v21 = vld [vmem:[%s1290_s6 + $0x18] sm:$0xff]   ;;  %v1039_v22 = vld [vmem:[%s1290_s6 + $0x20] sm:$0xff]   ;;  %v1040_v23 = vld [vmem:[%s1290_s6 + $0x28] sm:$0xff]  }
  0x5a   : > { %936 = vmatpush3.bf16.msra.mxu0 %v1035_v17  ;;  %951 = vmatprep.mubr.msk.bf16.mxu0 %vm1133_vm0, %v1132_v18  ;;  %v1041_v24 = vld [vmem:[%s1290_s6 + $0x30] sm:$0xff]   ;;  %v1042_v25 = vld [vmem:[%s1290_s6 + $0x38] sm:$0xff]   ;;  %v1046_v29 = vld [vmem:[%s1287_s24 + $0x10] sm:$0xff]  }
  0x5b   : > { %937 = vmatprep.subr.bf16.mxu0 %v1132_v18  ;;  %971 = vmatprep.mubr.msk.bf16.mxu1 %vm1133_vm0, %v1132_v18  ;;  %v1043_v26 = vld [vmem:[%s1263_s21] sm:$0xff]   ;;  %v1045_v28 = vld [vmem:[%s1287_s24 + $0x8] sm:$0xff]   ;;  %v1047_v30 = vld [vmem:[%s1287_s24 + $0x18] sm:$0xff]  }
  0x5c   : > { %v1044_v27 = vld [vmem:[%s1287_s24] sm:$0xff]   ;;  %v1049_v32 = vld [vmem:[%s1287_s24 + $0x28] sm:$0xff]   ;;  %v1050_v33 = vld [vmem:[%s1287_s24 + $0x30] sm:$0xff]  }
  0x5d   : > { %956 = vmatpush3.bf16.msra.mxu1 %v1044_v27  ;;  %v1048_v31 = vld [vmem:[%s1287_s24 + $0x20] sm:$0xff]   ;;  %v1051_v34 = vld [vmem:[%s1287_s24 + $0x38] sm:$0xff]   ;;  %v617_v55 = vld [vmem:[#allocation2 + $0x8] sm:$0xff] }
  0x5e   : > { %938 = vmatpush3.bf16.msra.mxu0 %v1036_v19  ;;  %957 = vmatprep.subr.bf16.mxu1 %v1132_v18  ;;  %v893_v35 = vld [vmem:[%s450_s20] ss:$0 sm:$0xff] }
  0x5f   : > { %939 = vmatprep.subr.bf16.mxu0 %v1132_v18  ;;  %v616_v53 = vld [vmem:[#allocation2] sm:$0xff] }
  0x60   : > { %v914_v62 = vld [vmem:[%s467_s25] ss:$0 sm:$0xff] (!%p913_p8) }
  0x61   : > { %958 = vmatpush3.bf16.msra.mxu1 %v1045_v28 }
  0x62   : > { %940 = vmatpush3.bf16.msra.mxu0 %v1037_v20  ;;  %959 = vmatprep.subr.bf16.mxu1 %v1132_v18 }
  0x63   : > { %941 = vmatprep.subr.bf16.mxu0 %v1132_v18 }
  0x65   : > { %960 = vmatpush3.bf16.msra.mxu1 %v1046_v29 }
  0x66   : > { %942 = vmatpush3.bf16.msra.mxu0 %v1038_v21  ;;  %961 = vmatprep.subr.bf16.mxu1 %v1132_v18 }
  0x67   : > { %943 = vmatprep.subr.bf16.mxu0 %v1132_v18 }
  0x69   : > { %962 = vmatpush3.bf16.msra.mxu1 %v1047_v30 }
  0x6a   : > { %944 = vmatpush3.bf16.msra.mxu0 %v1039_v22  ;;  %963 = vmatprep.subr.bf16.mxu1 %v1132_v18 }
  0x6b   : > { %945 = vmatprep.subr.bf16.mxu0 %v1132_v18 }
  0x6d   : > { %964 = vmatpush3.bf16.msra.mxu1 %v1048_v31 }
  0x6e   : > { %946 = vmatpush3.bf16.msra.mxu0 %v1040_v23  ;;  %965 = vmatprep.subr.bf16.mxu1 %v1132_v18 }
  0x6f   : > { %947 = vmatprep.subr.bf16.mxu0 %v1132_v18 }
  0x71   : > { %966 = vmatpush3.bf16.msra.mxu1 %v1049_v32 }
  0x72   : > { %948 = vmatpush3.bf16.msra.mxu0 %v1041_v24  ;;  %967 = vmatprep.subr.bf16.mxu1 %v1132_v18 }
  0x73   : > { %949 = vmatprep.subr.bf16.mxu0 %v1132_v18 }
  0x75   : > { %968 = vmatpush3.bf16.msra.mxu1 %v1050_v33 }
  0x76   : > { %950 = vmatpush3.bf16.msra.mxu0 %v1042_v25  ;;  %969 = vmatprep.subr.bf16.mxu1 %v1132_v18 }
  0x79   : > { %952 = vmatmul.mubr.bf16.vlgmr.msra.gmra.mrb[0].mxu0 %v1043_v26  ;;  %970 = vmatpush3.bf16.msra.mxu1 %v1051_v34 }
 0x14c   : > { %v595_v36 = vpop.f32.mrb[0].mxu0 }
 0x14d   : > { %v596_v37 = vadd.f32 %v893_v35, %v595_v36  ;;  %v953_v38 = vpop.f32.mrb[1].mxu0 }
 0x14e   : > { %v598_v39 = vpop.f32.mrb[2].mxu0 }
 0x14f   : > { %v903_v40 = vmul.f32 -1.442695, %v596_v37  ;;  %v599_v41 = vadd.f32 %v893_v35, %v598_v39  ;;  %v954_v42 = vpop.f32.mrb[3].mxu0 }
 0x151   : > { %1052 = vpow2.f32 %v903_v40  ;;  %v904_v43 = vmul.f32 -1.442695, %v599_v41 }
 0x153   : > { %1054 = vpow2.f32 %v904_v43 }
 0x15b   : > { %v1053_v44 = vpop.eup %1052 }
 0x15c   : > { %v608_v45 = vadd.f32 1.0, %v1053_v44 }
 0x15d   : > { %v1055_v46 = vpop.eup %1054 }
 0x15e   : > { %1056 = vrcp.f32 %v608_v45  ;;  %v609_v47 = vadd.f32 1.0, %v1055_v46 }
 0x160   : > { %1058 = vrcp.f32 %v609_v47 }
 0x168   : > { %v1057_v48 = vpop.eup %1056 }
 0x169   : > { %v614_v50 = vmul.f32 %v1057_v48, %v596_v37 }
 0x16a   : > { %v1059_v49 = vpop.eup %1058 }
 0x16b   : > { %v615_v51 = vmul.f32 %v1059_v49, %v599_v41 }
 0x16d   : > { %v618_v52 = vpack.c.bf16 %v615_v51, %v614_v50 }
 0x16f   : > { %972 = vmatmul.mubr.bf16.vlgmr.msra.gmra.mrb[0].mxu1 %v618_v52 }
 0x241   : > { %731 = sbr.rel (%p913_p8) target bundleno = 594 (0x252), region = 89 }
 0x242   : > { %v717_v54 = vpop.f32.mrb[0].mxu1 }
 0x243   : > { %v724_v56 = vadd.f32 %v717_v54, %v616_v53  ;;  %v973_v57 = vpop.f32.mrb[1].mxu1 }
 0x244   : > { %v720_v58 = vpop.f32.mrb[2].mxu1 }
 0x245   : > { %726 = vst [vmem:[#allocation2] sm:$0xff] %v724_v56  ;;  %v725_v59 = vadd.f32 %v720_v58, %v617_v55  ;;  %v974_v60 = vpop.f32.mrb[3].mxu1 }
 0x247   : > { %727 = vst [vmem:[#allocation2 + $0x8] sm:$0xff] %v725_v59 }
 0x24c   : > { %v732_v61 = vld [vmem:[#allocation2] sm:$0xff] }
 0x24d   : > { %v741_v0 = vadd.f32 %v914_v62, %v732_v61 }
 0x24e   : > { %v733_v63 = vld [vmem:[#allocation2 + $0x8] sm:$0xff] }
 0x24f   : > { %v742_v1 = vadd.f32 %v914_v62, %v733_v63  ;;  %743 = vst [vmem:[%s1270_s11] sm:$0xff] %v741_v0 }
 0x251   : > { %744 = vst [vmem:[%s1270_s11 + $0x8] sm:$0xff] %v742_v1 }
 0x252 PF: > { %s22_s7 = sadd.s32 1, %s1128_s7   ;;  %s1357_s26 = smov %s1108_s27 }
 0x253   : > { %p19_p9 = scmp.ge.s32.totalorder %s22_s7, 26   ;;  %s1358_s27 = smov %s1223_s16 }
 0x254   : > { %s1359_s28 = smov %s1120_s29  ;;  %s1360_s0 = smov %s1124_s30 }
 0x255   : > { %s1361_s29 = smov %s1368_s8  ;;  %s1362_s30 = smov %s1366_s9 }
 0x256   :  { %21 = sbr.rel (!%p19_p9) target bundleno = 20 (0x14), region = 136 }

</bundles_post_ra>
